<compile_context>
chip_gen: v5e
topology: v5e:2x2
jax: 0.10.0
libtpu: 0.0.40
codegen_flags: <defaults>
</compile_context>

<pallas_src>
import jax
import jax.numpy as jnp
from jax.experimental import pallas as pl
from jax.experimental.pallas import tpu as pltpu

HIDDEN = 128  # fixed by the PyTorch module


# ------------------------------- Pallas kernel -------------------------------

def dueling_kernel(x_ref,
                   w1_ref, b1_ref,     # feature layer           [d_in,128] / [1,128]
                   wva_ref, bva_ref,   # fused V|A hidden layer   [128,256]  / [1,256]
                   wq_ref, bq_ref,     # folded Q head            [256,A]    / [1,A]
                   out_ref):
    # feature layer: Linear(d_in, 128) + ReLU   (MXU bf16 ops, f32 accumulate)
    x_bf = x_ref[...].astype(jnp.bfloat16)
    feat = jnp.dot(x_bf, w1_ref[...], preferred_element_type=jnp.float32)
    feat = jnp.maximum(feat + b1_ref[...], 0.0)                   # [tb, 128] f32

    # fused value/advantage hidden layers: one [128, 256] matmul + ReLU
    va = jnp.dot(feat.astype(jnp.bfloat16), wva_ref[...],
                 preferred_element_type=jnp.float32)
    va = jnp.maximum(va + bva_ref[...], 0.0)                      # [tb, 256] f32

    # folded Q head: value + (advantage - mean(advantage)) in one matmul
    q = jnp.dot(va.astype(jnp.bfloat16), wq_ref[...],
                preferred_element_type=jnp.float32)
    out_ref[...] = q + bq_ref[...]                                # [tb, A] f32


# ----------------------------- parameter packing -----------------------------

def pack_params(params):
    """Fuse / fold / cast the PyTorch-style parameters for the kernel.

    Call ONCE at parameter-load time (hoisted out of the per-step forward).
    """
    (w1, b1, wv1, bv1, wv2, bv2, wa1, ba1, wa2, ba2) = params
    num_actions = wa2.shape[1]

    w1_bf = w1.astype(jnp.bfloat16)                                    # [d_in,128]
    wva_bf = jnp.concatenate([wv1, wa1], axis=1).astype(jnp.bfloat16)  # [128, 256]
    bva = jnp.concatenate([bv1, ba1], axis=1)                          # [1, 256] f32

    # Fold value head, advantage head and mean-subtraction into one linear map.
    # Done in f32, then cast to bf16 for the MXU.
    wa2_centered = wa2 - jnp.mean(wa2, axis=1, keepdims=True)          # [128, A]
    wq = jnp.concatenate(
        [jnp.broadcast_to(wv2, (HIDDEN, num_actions)), wa2_centered], axis=0)
    wq_bf = wq.astype(jnp.bfloat16)                                    # [256, A]
    bq = bv2 + ba2 - jnp.mean(ba2, axis=1, keepdims=True)              # [1, A] f32

    return (w1_bf, b1, wva_bf, bva, wq_bf, bq)


# --------------------------------- forward -----------------------------------

def _pick_batch_tile(B: int) -> int:
    """Batch tile: full batch when small; large (>=256-row) tiles otherwise.

    Big tiles amortize the ~0.35 us per-grid-step overhead; when the batch is
    large we keep >= 2 grid steps so the "parallel" batch axis can be sharded
    across both TensorCores on v7x.
    """
    if B <= 256:
        return B                       # block == array dim is always legal
    tb = (min(B, 2048) // 256) * 256   # multiple of 256 (also 128 for v5e)
    while tb > 256 and pl.cdiv(B, tb) < 2:
        tb //= 2
    return tb


def dueling_forward(x, packed):
    """x: [B, d_in] f32; packed: output of pack_params. Returns [B, A] f32."""
    (w1_bf, b1, wva_bf, bva, wq_bf, bq) = packed
    B, d_in = x.shape
    num_actions = wq_bf.shape[1]

    tb = _pick_batch_tile(B)
    nb = pl.cdiv(B, tb)

    def resident(arr):  # full-array block, constant index_map -> VMEM-resident
        return pl.BlockSpec(arr.shape, lambda i: (0, 0))

    # NOTE(v7x): plain "parallel" is kept for portability; pltpu.CORE_PARALLEL
    # on the batch axis is the lever to force both TensorCores once nb >= 2.
    # NOTE: if the upstream producer emits x natively in bf16, accept it and
    # drop the in-kernel cast (halves the x DMA); do NOT add a wrapper cast.
    return pl.pallas_call(
        dueling_kernel,
        out_shape=jax.ShapeDtypeStruct((B, num_actions), jnp.float32),
        grid=(nb,),
        in_specs=[pl.BlockSpec((tb, d_in), lambda i: (i, 0)),
                  resident(w1_bf), resident(b1),
                  resident(wva_bf), resident(bva),
                  resident(wq_bf), resident(bq)],
        out_specs=pl.BlockSpec((tb, num_actions), lambda i: (i, 0)),
        compiler_params=pltpu.CompilerParams(
            dimension_semantics=("parallel",)),
    )(x, w1_bf, b1, wva_bf, bva, wq_bf, bq)


# ----------------------------- test scaffolding ------------------------------

def init_params(key, input_size, output_size, hidden=HIDDEN):
    """Deterministic synthetic init (uniform, PyTorch-Linear-like fan-in scaling)."""
    ks = jax.random.split(key, 10)

    def lin(kw, kb, fan_in, fan_out):
        bound = 1.0 / jnp.sqrt(jnp.float32(fan_in))
        w = jax.random.uniform(kw, (fan_in, fan_out), jnp.float32, -bound, bound)
        b = jax.random.uniform(kb, (1, fan_out), jnp.float32, -bound, bound)
        return w, b

    w1, b1 = lin(ks[0], ks[1], input_size, hidden)       # feature_layer
    wv1, bv1 = lin(ks[2], ks[3], hidden, hidden)          # value_stream[0]
    wv2, bv2 = lin(ks[4], ks[5], hidden, 1)               # value_stream[2]
    wa1, ba1 = lin(ks[6], ks[7], hidden, hidden)          # advantage_stream[0]
    wa2, ba2 = lin(ks[8], ks[9], hidden, output_size)     # advantage_stream[2]
    return (w1, b1, wv1, bv1, wv2, bv2, wa1, ba1, wa2, ba2)


def reference_forward_f32(x, params):
    """Exact PyTorch-semantics math in f32 (loose sanity check)."""
    (w1, b1, wv1, bv1, wv2, bv2, wa1, ba1, wa2, ba2) = params
    feat = jnp.maximum(x @ w1 + b1, 0.0)
    v = jnp.maximum(feat @ wv1 + bv1, 0.0) @ wv2 + bv2
    a = jnp.maximum(feat @ wa1 + ba1, 0.0) @ wa2 + ba2
    return v + (a - a.mean(axis=1, keepdims=True))


def reference_forward_kernel_math(x, packed):
    """Same folded / bf16-operand / f32-accumulate math as the kernel (tight check)."""
    (w1_bf, b1, wva_bf, bva, wq_bf, bq) = packed

    def mm(a, w):
        return jnp.dot(a.astype(jnp.bfloat16), w, preferred_element_type=jnp.float32)

    feat = jnp.maximum(mm(x, w1_bf) + b1, 0.0)
    va = jnp.maximum(mm(feat, wva_bf) + bva, 0.0)
    return mm(va, wq_bf) + bq


if __name__ == "__main__":
    input_size = 32   # observation dim
    output_size = 8   # number of actions

    key = jax.random.PRNGKey(0)
    kx, kp, kx2, kx3 = jax.random.split(key, 4)
    params = init_params(kp, input_size, output_size)

    # Pack ONCE (hoisted out of the per-call path), then jit the forward.
    packed = pack_params(params)
    packed = jax.tree_util.tree_map(jax.block_until_ready, packed)
    fwd = jax.jit(dueling_forward)

    def check(x, atol_kernel=2e-3):
        q = jax.block_until_ready(fwd(x, packed))
        assert q.shape == (x.shape[0], output_size)
        q_km = reference_forward_kernel_math(x, packed)
        q_f32 = reference_forward_f32(x, params)
        assert jnp.allclose(q, q_km, atol=atol_kernel, rtol=atol_kernel), \
            "mismatch vs kernel-math (bf16) reference"
        assert jnp.allclose(q, q_f32, atol=1e-1, rtol=1e-1), \
            "mismatch vs exact f32 reference"
        return q

    # --- small batch: single block (block shape == array shape) ---
    x_small = jax.random.normal(kx, (8, input_size), jnp.float32)
    check(x_small)

    # --- ragged batch: 300 rows -> tb=256, nb=2, partial final tile ---
    x_ragged = jax.random.normal(kx2, (300, input_size), jnp.float32)
    check(x_ragged)

    # --- larger even batch: exercises the multi-step batch grid ---
    x_big = jax.random.normal(kx3, (512, input_size), jnp.float32)
    check(x_big)

    print("KERNEL_OK")
</pallas_src>

<mosaic_0001>
module attributes {stable_mosaic.version = 11 : i64} {
  func.func @dueling_kernel(%arg0: i32, %arg1: memref<8x32xf32, #tpu.memory_space<vmem>>, %arg2: memref<32x128xbf16, #tpu.memory_space<vmem>>, %arg3: memref<1x128xf32, #tpu.memory_space<vmem>>, %arg4: memref<128x256xbf16, #tpu.memory_space<vmem>>, %arg5: memref<1x256xf32, #tpu.memory_space<vmem>>, %arg6: memref<256x8xbf16, #tpu.memory_space<vmem>>, %arg7: memref<1x8xf32, #tpu.memory_space<vmem>>, %arg8: memref<8x8xf32, #tpu.memory_space<vmem>>) attributes {dimension_semantics = [#tpu.dimension_semantics<parallel>], iteration_bounds = array<i64: 1>, scalar_prefetch = 0 : i64, scratch_operands = 0 : i64, tpu.core_type = #tpu.core_type<tc>, window_params = [{transform_indices = @transform_0, window_bounds = array<i64: 8, 32>}, {pipeline_mode = #tpu.pipeline_mode<synchronous>, transform_indices = @transform_1, window_bounds = array<i64: 32, 128>}, {pipeline_mode = #tpu.pipeline_mode<synchronous>, transform_indices = @transform_2, window_bounds = array<i64: 1, 128>}, {pipeline_mode = #tpu.pipeline_mode<synchronous>, transform_indices = @transform_3, window_bounds = array<i64: 128, 256>}, {pipeline_mode = #tpu.pipeline_mode<synchronous>, transform_indices = @transform_4, window_bounds = array<i64: 1, 256>}, {pipeline_mode = #tpu.pipeline_mode<synchronous>, transform_indices = @transform_5, window_bounds = array<i64: 256, 8>}, {pipeline_mode = #tpu.pipeline_mode<synchronous>, transform_indices = @transform_6, window_bounds = array<i64: 1, 8>}, {transform_indices = @transform_7, window_bounds = array<i64: 8, 8>}]} {
    %c0 = arith.constant 0 : index
    %c0_0 = arith.constant 0 : index
    %0 = vector.load %arg1[%c0, %c0_0] : memref<8x32xf32, #tpu.memory_space<vmem>>, vector<8x32xf32>
    %1 = arith.truncf %0 : vector<8x32xf32> to vector<8x32xbf16>
    %c0_1 = arith.constant 0 : index
    %c0_2 = arith.constant 0 : index
    %2 = vector.load %arg2[%c0_1, %c0_2] : memref<32x128xbf16, #tpu.memory_space<vmem>>, vector<32x128xbf16>
    %cst = arith.constant dense<0.000000e+00> : vector<8x128xf32>
    %3 = tpu.matmul %1, %2, %cst {dimension_numbers = #tpu.dot_dimension_numbers<[1], [0], [0], [1], [0, 0, 1, 1], [], []>} : vector<8x32xbf16>, vector<32x128xbf16>, vector<8x128xf32> -> vector<8x128xf32>
    %c0_3 = arith.constant 0 : index
    %c0_4 = arith.constant 0 : index
    %4 = vector.load %arg3[%c0_3, %c0_4] : memref<1x128xf32, #tpu.memory_space<vmem>>, vector<1x128xf32>
    %5 = vector.broadcast %4 : vector<1x128xf32> to vector<8x128xf32>
    %6 = arith.addf %3, %5 : vector<8x128xf32>
    %cst_5 = arith.constant 0.000000e+00 : f32
    %7 = vector.broadcast %cst_5 : f32 to vector<8x128xf32>
    %8 = arith.maximumf %6, %7 : vector<8x128xf32>
    %9 = arith.truncf %8 : vector<8x128xf32> to vector<8x128xbf16>
    %c0_6 = arith.constant 0 : index
    %c0_7 = arith.constant 0 : index
    %10 = vector.load %arg4[%c0_6, %c0_7] : memref<128x256xbf16, #tpu.memory_space<vmem>>, vector<128x256xbf16>
    %cst_8 = arith.constant dense<0.000000e+00> : vector<8x256xf32>
    %11 = tpu.matmul %9, %10, %cst_8 {dimension_numbers = #tpu.dot_dimension_numbers<[1], [0], [0], [1], [0, 0, 1, 1], [], []>} : vector<8x128xbf16>, vector<128x256xbf16>, vector<8x256xf32> -> vector<8x256xf32>
    %c0_9 = arith.constant 0 : index
    %c0_10 = arith.constant 0 : index
    %12 = vector.load %arg5[%c0_9, %c0_10] : memref<1x256xf32, #tpu.memory_space<vmem>>, vector<1x256xf32>
    %13 = vector.broadcast %12 : vector<1x256xf32> to vector<8x256xf32>
    %14 = arith.addf %11, %13 : vector<8x256xf32>
    %cst_11 = arith.constant 0.000000e+00 : f32
    %15 = vector.broadcast %cst_11 : f32 to vector<8x256xf32>
    %16 = arith.maximumf %14, %15 : vector<8x256xf32>
    %17 = arith.truncf %16 : vector<8x256xf32> to vector<8x256xbf16>
    %c0_12 = arith.constant 0 : index
    %c0_13 = arith.constant 0 : index
    %18 = vector.load %arg6[%c0_12, %c0_13] : memref<256x8xbf16, #tpu.memory_space<vmem>>, vector<256x8xbf16>
    %cst_14 = arith.constant dense<0.000000e+00> : vector<8x8xf32>
    %19 = tpu.matmul %17, %18, %cst_14 {dimension_numbers = #tpu.dot_dimension_numbers<[1], [0], [0], [1], [0, 0, 1, 1], [], []>} : vector<8x256xbf16>, vector<256x8xbf16>, vector<8x8xf32> -> vector<8x8xf32>
    %c0_15 = arith.constant 0 : index
    %c0_16 = arith.constant 0 : index
    %20 = vector.load %arg7[%c0_15, %c0_16] : memref<1x8xf32, #tpu.memory_space<vmem>>, vector<1x8xf32>
    %21 = vector.broadcast %20 : vector<1x8xf32> to vector<8x8xf32>
    %22 = arith.addf %19, %21 : vector<8x8xf32>
    %c0_17 = arith.constant 0 : index
    %c0_18 = arith.constant 0 : index
    %23 = vector.load %arg8[%c0_17, %c0_18] : memref<8x8xf32, #tpu.memory_space<vmem>>, vector<8x8xf32>
    tpu.vector_store %arg8[%c0_17, %c0_18], %22 {strides = array<i32>} : memref<8x8xf32, #tpu.memory_space<vmem>>, vector<8x8xf32>,
    return
  }
  func.func @transform_0(%arg0: i32) -> (i32, i32) {
    %c0_i32 = arith.constant 0 : i32
    %c0_i32_0 = arith.constant 0 : i32
    return %arg0, %c0_i32 : i32, i32
  }
  func.func @transform_1(%arg0: i32) -> (i32, i32) {
    %c0_i32 = arith.constant 0 : i32
    %c0_i32_0 = arith.constant 0 : i32
    %c0_i32_1 = arith.constant 0 : i32
    return %c0_i32, %c0_i32_0 : i32, i32
  }
  func.func @transform_2(%arg0: i32) -> (i32, i32) {
    %c0_i32 = arith.constant 0 : i32
    %c0_i32_0 = arith.constant 0 : i32
    %c0_i32_1 = arith.constant 0 : i32
    return %c0_i32, %c0_i32_0 : i32, i32
  }
  func.func @transform_3(%arg0: i32) -> (i32, i32) {
    %c0_i32 = arith.constant 0 : i32
    %c0_i32_0 = arith.constant 0 : i32
    %c0_i32_1 = arith.constant 0 : i32
    return %c0_i32, %c0_i32_0 : i32, i32
  }
  func.func @transform_4(%arg0: i32) -> (i32, i32) {
    %c0_i32 = arith.constant 0 : i32
    %c0_i32_0 = arith.constant 0 : i32
    %c0_i32_1 = arith.constant 0 : i32
    return %c0_i32, %c0_i32_0 : i32, i32
  }
  func.func @transform_5(%arg0: i32) -> (i32, i32) {
    %c0_i32 = arith.constant 0 : i32
    %c0_i32_0 = arith.constant 0 : i32
    %c0_i32_1 = arith.constant 0 : i32
    return %c0_i32, %c0_i32_0 : i32, i32
  }
  func.func @transform_6(%arg0: i32) -> (i32, i32) {
    %c0_i32 = arith.constant 0 : i32
    %c0_i32_0 = arith.constant 0 : i32
    %c0_i32_1 = arith.constant 0 : i32
    return %c0_i32, %c0_i32_0 : i32, i32
  }
  func.func @transform_7(%arg0: i32) -> (i32, i32) {
    %c0_i32 = arith.constant 0 : i32
    %c0_i32_0 = arith.constant 0 : i32
    return %arg0, %c0_i32 : i32, i32
  }
}

</mosaic_0001>

<bundles_post_ra>
// kernel: dueling_forward.1
= control target key start
LH: loop header
LB: loop body
LE: loop exit
PB: predicated region body
PF: predicated region fallthrough
CT: control target
= control target key end

     0   :  { %12 = vsyncpa [#allocation3], 0  ;;  %s872_s0 = inlined_call_operand.vmem [shape: f32[8,32], index: 0, kind: input, shape index: {}]   ;;  %s873_s1 = inlined_call_operand.hbm [shape: bf16[32,128], index: 1, kind: input, shape index: {}]   ;;  %s874_s2 = inlined_call_operand.hbm [shape: f32[1,128], index: 2, kind: input, shape index: {}]   ;;  %s875_s3 = inlined_call_operand.vmem [shape: bf16[128,256], index: 3, kind: input, shape index: {}]   ;;  %s876_s4 = inlined_call_operand.vmem [shape: f32[1,256], index: 4, kind: input, shape index: {}]   ;;  %s877_s5 = inlined_call_operand.vmem [shape: bf16[256,8], index: 5, kind: input, shape index: {}]   ;;  %s878_s6 = inlined_call_operand.vmem [shape: f32[1,8], index: 6, kind: input, shape index: {}]   ;;  %s879_s7 = inlined_call_operand.hbm [shape: f32[8,8], index: 7, kind: output, shape index: {}]  }
   0x1   :  { %13 = vsyncpa [#allocation6], 0 }
   0x2   :  { %14 = vsyncpa [#allocation4], 0  ;;  %s21_s26 = sshll.u32 %s873_s1, 4  ;;  %s665_s27 = smov [#allocation2]   ;;  %s22_s26 = int_to_ptr.hbm [resolvable:$true] %s21_s26 }
   0x3   :  { %s23_s28 = sshll.u32 %s665_s27, 4  ;;  %s35_s8 = sshll.u32 %s874_s2, 4  ;;  %s24_s28 = int_to_ptr.vmem [resolvable:$true] %s23_s28  ;;  %s36_s8 = int_to_ptr.hbm [resolvable:$true] %s35_s8 }
   0x4   :  { %s666_s9 = smov 64   ;;  %s667_s10 = smov 4  }
   0x5   :  { %29 = dma.hbm_to_vmem [thread:$0]  %s22_s26, 256, %s24_s28, [#allocation3], %s666_s9, %s666_s9, %s667_s10  }
   0x6   :  { %s668_s11 = smov [#allocation5]  }
   0x7   :  { %s37_s12 = sshll.u32 %s668_s11, 4  ;;  %s38_s12 = int_to_ptr.vmem [resolvable:$true] %s37_s12 }
   0x8   :  { %40 = dma.hbm_to_vmem [thread:$0]  %s36_s8, 16, %s38_s12, [#allocation6]  }
   0x9   :  { %659 = dma.done.wait [#allocation3], 256  }
   0xa   :  { %660 = vsyncadd [#allocation3], 4294967040 }
   0xb   :  { %661 = dma.done.wait [#allocation6], 16  }
   0xc   :  { %662 = vsyncadd [#allocation6], 4294967280  ;;  %v547_v0 = vld [vmem:[#allocation2 + $0x8] sm:$0xff]  ;;  %v546_v1 = vld [vmem:[#allocation2] sm:$0xff]  ;;  %vm80_vm0 = vcmask 261120   ;;  %s398_s11 = sshll.u32 %s879_s7, 4  ;;  %s399_s11 = int_to_ptr.hbm [resolvable:$true] %s398_s11 }
   0xd   :  { %v58_v2 = vld [vmem:[%s872_s0] sm:$0xff]  ;;  %v476_v3 = vld [vmem:[%s875_s3 + $0x70] sm:$0xf]  ;;  %v563_v4 = vld [vmem:[%s875_s3 + $0x74] sm:$0xf0]  ;;  %90 = vmatpush.bf16.msra.mxu0 %v547_v0  ;;  %vm389_vm1 = vcmask 64512  }
   0xe   :  { %v562_v5 = vld [vmem:[%s875_s3 + $0x74] sm:$0xf]  ;;  %v477_v6 = vor.u32 %v563_v4, %v476_v3  ;;  %v478_v7 = vld [vmem:[%s875_s3 + $0x78] sm:$0xf0]  ;;  %v468_v8 = vld [vmem:[%s875_s3 + $0x60] sm:$0xf]  ;;  %v59_v14 = vpack.c.bf16 %v58_v2, %v58_v2 }
   0xf   :  { %v561_v9 = vld [vmem:[%s875_s3 + $0x64] sm:$0xf0]  ;;  %v481_v10 = vor.u32 %v562_v5, %v478_v7  ;;  %v560_v11 = vld [vmem:[%s875_s3 + $0x64] sm:$0xf]  ;;  %v470_v12 = vld [vmem:[%s875_s3 + $0x68] sm:$0xf0] }
  0x10   :  { %201 = vmatpush.bf16.msra.mxu1 %v477_v6  ;;  %v469_v13 = vor.u32 %v561_v9, %v468_v8  ;;  %v473_v15 = vor.u32 %v560_v11, %v470_v12  ;;  %v460_v16 = vld [vmem:[%s875_s3 + $0x50] sm:$0xf]  ;;  %v559_v17 = vld [vmem:[%s875_s3 + $0x54] sm:$0xf0]  ;;  %v558_v18 = vld [vmem:[%s875_s3 + $0x54] sm:$0xf] }
  0x11   :  { %214 = vmatpush.bf16.msra.mxu2 %v481_v10  ;;  %91 = vmatpush.bf16.msra.mxu0 %v546_v1  ;;  %v462_v19 = vld [vmem:[%s875_s3 + $0x58] sm:$0xf0]  ;;  %v461_v20 = vor.u32 %v559_v17, %v460_v16  ;;  %v452_v21 = vld [vmem:[%s875_s3 + $0x40] sm:$0xf]  ;;  %v557_v23 = vld [vmem:[%s875_s3 + $0x44] sm:$0xf0] }
  0x12   :  { %v465_v22 = vor.u32 %v558_v18, %v462_v19  ;;  %v556_v24 = vld [vmem:[%s875_s3 + $0x44] sm:$0xf]  ;;  %v454_v25 = vld [vmem:[%s875_s3 + $0x48] sm:$0xf0]  ;;  %v453_v26 = vor.u32 %v557_v23, %v452_v21  ;;  %v444_v28 = vld [vmem:[%s875_s3 + $0x30] sm:$0xf] }
  0x13   :  { %v457_v27 = vor.u32 %v556_v24, %v454_v25  ;;  %v555_v29 = vld [vmem:[%s875_s3 + $0x34] sm:$0xf0]  ;;  %v554_v30 = vld [vmem:[%s875_s3 + $0x34] sm:$0xf]  ;;  %v446_v31 = vld [vmem:[%s875_s3 + $0x38] sm:$0xf0] }
  0x14   :  { %202 = vmatpush.bf16.msra.mxu1 %v469_v13  ;;  %417 = vmatmul.msk.bf16.vlgmr.msra.gmra.mxu0 %vm80_vm0, %v59_v14  ;;  %v445_v32 = vor.u32 %v555_v29, %v444_v28  ;;  %v449_v33 = vor.u32 %v554_v30, %v446_v31  ;;  %v436_v34 = vld [vmem:[%s875_s3 + $0x20] sm:$0xf]  ;;  %v553_v35 = vld [vmem:[%s875_s3 + $0x24] sm:$0xf0]  ;;  %v552_v36 = vld [vmem:[%s875_s3 + $0x24] sm:$0xf] }
  0x15   :  { %215 = vmatpush.bf16.msra.mxu2 %v473_v15  ;;  %v438_v37 = vld [vmem:[%s875_s3 + $0x28] sm:$0xf0]  ;;  %v437_v38 = vor.u32 %v553_v35, %v436_v34  ;;  %v428_v40 = vld [vmem:[%s875_s3 + $0x10] sm:$0xf]  ;;  %v551_v41 = vld [vmem:[%s875_s3 + $0x14] sm:$0xf0] }
  0x16   :  { %v441_v39 = vor.u32 %v552_v36, %v438_v37  ;;  %v550_v42 = vld [vmem:[%s875_s3 + $0x14] sm:$0xf]  ;;  %v429_v43 = vor.u32 %v551_v41, %v428_v40  ;;  %v430_v44 = vld [vmem:[%s875_s3 + $0x18] sm:$0xf0]  ;;  %v420_v46 = vld [vmem:[%s875_s3] sm:$0xf] }
  0x17   :  { %v433_v45 = vor.u32 %v550_v42, %v430_v44  ;;  %v549_v47 = vld [vmem:[%s875_s3 + $0x4] sm:$0xf0]  ;;  %v548_v48 = vld [vmem:[%s875_s3 + $0x4] sm:$0xf]  ;;  %v422_v50 = vld [vmem:[%s875_s3 + $0x8] sm:$0xf0] }
  0x18   :  { %203 = vmatpush.bf16.msra.mxu1 %v461_v20  ;;  %v421_v49 = vor.u32 %v549_v47, %v420_v46  ;;  %v425_v51 = vor.u32 %v548_v48, %v422_v50  ;;  %v571_v52 = vld [vmem:[%s877_s5 + $0x38] sm:$0xff]  ;;  %v570_v54 = vld [vmem:[%s877_s5 + $0x30] sm:$0xff]  ;;  %v569_v56 = vld [vmem:[%s877_s5 + $0x28] sm:$0xff] }
  0x19   :  { %216 = vmatpush.bf16.msra.mxu2 %v465_v22  ;;  %v579_v53 = vld [vmem:[%s877_s5 + $0x78] sm:$0xff]  ;;  %363 = vmatpush.bf16.msra.mxu3 %v571_v52  ;;  %v578_v55 = vld [vmem:[%s877_s5 + $0x70] sm:$0xff]  ;;  %v577_v57 = vld [vmem:[%s877_s5 + $0x68] sm:$0xff] }
  0x1a   :  { %376 = vmatpush.bf16.msrb.mxu0 %v579_v53  ;;  %v568_v58 = vld [vmem:[%s877_s5 + $0x20] sm:$0xff]  ;;  %v567_v60 = vld [vmem:[%s877_s5 + $0x18] sm:$0xff]  ;;  %v566_v62 = vld [vmem:[%s877_s5 + $0x10] sm:$0xff] }
  0x1b   :  { %v576_v59 = vld [vmem:[%s877_s5 + $0x60] sm:$0xff]  ;;  %v575_v61 = vld [vmem:[%s877_s5 + $0x58] sm:$0xff]  ;;  %v585_v63 = vld [vmem:[#allocation5] ss:$0 sm:$0xff] }
  0x1c   :  { %204 = vmatpush.bf16.msra.mxu1 %v453_v26  ;;  %v565_v5 = vld [vmem:[%s877_s5 + $0x8] sm:$0xff]  ;;  %v574_v6 = vld [vmem:[%s877_s5 + $0x50] sm:$0xff]  ;;  %v564_v7 = vld [vmem:[%s877_s5] sm:$0xff] }
  0x1d   :  { %217 = vmatpush.bf16.msra.mxu2 %v457_v27  ;;  %364 = vmatpush.bf16.msra.mxu3 %v570_v54  ;;  %v573_v8 = vld [vmem:[%s877_s5 + $0x48] sm:$0xff]  ;;  %v572_v9 = vld [vmem:[%s877_s5 + $0x40] sm:$0xff] }
  0x1e   :  { %377 = vmatpush.bf16.msrb.mxu0 %v578_v55  ;;  %v115_v10 = vld [vmem:[%s876_s4] sm:$0x3]  ;;  %s669_s4 = smov [#allocation7]  }
  0x1f   :  { %v117_v11 = vperm.slane %v115_v10, 0  ;;  %v118_v15 = vperm.slane %v115_v10, 1  ;;  %v586_v23 = vld [vmem:[%s878_s6] ss:$0 sm:$0xff]  ;;  %s396_s3 = sshll.u32 %s669_s4, 4  ;;  %s397_s3 = int_to_ptr.vmem [resolvable:$true] %s396_s3 }
  0x20   :  { %205 = vmatpush.bf16.msra.mxu1 %v445_v32 }
  0x21   :  { %218 = vmatpush.bf16.msra.mxu2 %v449_v33  ;;  %365 = vmatpush.bf16.msra.mxu3 %v569_v56 }
  0x22   :  { %378 = vmatpush.bf16.msrb.mxu0 %v577_v57 }
  0x24   :  { %206 = vmatpush.bf16.msra.mxu1 %v437_v38 }
  0x25   :  { %219 = vmatpush.bf16.msra.mxu2 %v441_v39  ;;  %366 = vmatpush.bf16.msra.mxu3 %v568_v58 }
  0x26   :  { %379 = vmatpush.bf16.msrb.mxu0 %v576_v59 }
  0x28   :  { %207 = vmatpush.bf16.msra.mxu1 %v429_v43 }
  0x29   :  { %220 = vmatpush.bf16.msra.mxu2 %v433_v45  ;;  %367 = vmatpush.bf16.msra.mxu3 %v567_v60 }
  0x2a   :  { %380 = vmatpush.bf16.msrb.mxu0 %v575_v61 }
  0x2c   :  { %208 = vmatpush.bf16.msra.mxu1 %v421_v49 }
  0x2d   :  { %221 = vmatpush.bf16.msra.mxu2 %v425_v51  ;;  %368 = vmatpush.bf16.msra.mxu3 %v566_v62 }
  0x2e   :  { %381 = vmatpush.bf16.msrb.mxu0 %v574_v6 }
  0x31   :  { %369 = vmatpush.bf16.msra.mxu3 %v565_v5 }
  0x32   :  { %382 = vmatpush.bf16.msrb.mxu0 %v573_v8 }
  0x35   :  { %370 = vmatpush.bf16.msra.mxu3 %v564_v7 }
  0x36   :  { %383 = vmatpush.bf16.msrb.mxu0 %v572_v9 }
  0x91   :  { %v93_v0 = vpop.f32.mrf.mxu0 }
  0x92   :  { %v94_v1 = vadd.f32 %v585_v63, %v93_v0 }
  0x94   :  { %v97_v2 = vmax.f32 %v94_v1, 0.0 }
  0x96   :  { %v98_v3 = vpack.c.bf16 %v97_v2, %v97_v2 }
  0x98   :  { %209 = vmatmul.bf16.vlgmr.msra.gmra.mxu1 %v98_v3  ;;  %222 = vmatmul.bf16.vlgmr.msra.gmra.mxu2 %v98_v3 }
  0x99   :  { %v95_v4 = vpop.f32.mrf.mxu0 }
 0x115   :  { %v210_v12 = vpop.f32.mrf.mxu1 }
 0x116   :  { %v211_v13 = vadd.f32 %v210_v12, %v117_v11 }
 0x118   :  { %v227_v14 = vmax.f32 %v211_v13, 0.0 }
 0x11a   :  { %v229_v16 = vpack.c.bf16 %v227_v14, %v227_v14 }
 0x11b   :  { %v223_v17 = vpop.f32.mrf.mxu2 }
 0x11c   :  { %v224_v18 = vadd.f32 %v223_v17, %v118_v15  ;;  %371 = vmatmul.bf16.vlgmr.msra.gmra.mxu3 %v229_v16 }
 0x11d   :  { %v212_v19 = vpop.f32.mrf.mxu1 }
 0x11e   :  { %v228_v20 = vmax.f32 %v224_v18, 0.0 }
 0x120   :  { %v230_v21 = vpack.c.bf16 %v228_v20, %v228_v20 }
 0x122   :  { %384 = vmatmul.bf16.vlgmr.msrb.gmra.mxu0 %v230_v21 }
 0x123   :  { %v225_v22 = vpop.f32.mrf.mxu2 }
 0x19f   :  { %v372_v24 = vpop.f32.mrf.mxu3  ;;  %v385_v25 = vpop.f32.mrf.mxu0 }
 0x1a0   :  { %v373_v26 = vadd.f32 %v586_v23, %v372_v24 }
 0x1a2   :  { %v386_v27 = vadd.f32 %v385_v25, %v373_v26 }
 0x1a4   :  { %390 = vst.msk [vmem:[#allocation7] sm:$0xff] %vm389_vm1, %v386_v27 }
 0x1a5   :  { %401 = dma.vmem_to_hbm [thread:$0]  %s397_s3, 128, %s399_s11, [#allocation4]  }
 0x1a7   :  { %v374_v28 = vpop.f32.mrf.mxu3  ;;  %v387_v29 = vpop.f32.mrf.mxu0 }
 0x1a8   :  { %663 = dma.done.wait [#allocation4], 128  }
 0x1a9   :  { %664 = vsyncadd [#allocation4], 4294967168 }
 0x1aa   :  { %406 = vsyncpa [#allocation3], 1 }
 0x1ab   :  { %407 = vsyncpa [#allocation6], 1 }
 0x1ac   :  { %408 = vsyncpa [#allocation4], 1 }

</bundles_post_ra>
